<compile_context>
chip_gen: v7x
topology: tpu7x:2x2x1
jax: 0.10.0
libtpu: 0.0.40
codegen_flags: <defaults>
</compile_context>

<pallas_src>
import jax
import jax.numpy as jnp
from jax import lax
from jax.experimental import pallas as pl
from jax.experimental.pallas import tpu as pltpu  # noqa: F401  (TPU backend)


def _model_kernel(x1_ref, x2_ref, w_ref, b_ref, o_ref):
    # v1t = W @ x1_pad.T + b[:,None]   -> (5, 128)  (lane-dense intermediate)
    v1t = lax.dot_general(
        w_ref[...], x1_ref[...],
        dimension_numbers=(((1,), (1,)), ((), ())),
        preferred_element_type=jnp.float32,
    ) + b_ref[...]                                    # (5,128) + (5,1) broadcast
    # out = x2_pad @ v1t   -> (8, 128): standard [M,K]x[K,N] contraction,
    # stored as one full dense vreg (no masked vst).
    o_ref[...] = lax.dot_general(
        x2_ref[...], v1t,
        dimension_numbers=(((1,), (0,)), ((), ())),
        preferred_element_type=jnp.float32,
    )


@jax.jit
def model_forward(x1, x2, w, b):
    m1, k = x1.shape            # (2, 5)
    m2, _ = x2.shape            # (3, 5)
    # Pad batch dims so the kernel's output tile is a full (8, 128) vreg.
    m1p = ((m1 + 127) // 128) * 128      # -> 128 (output lane dim)
    m2p = ((m2 + 7) // 8) * 8            # -> 8   (output sublane dim)
    x1p = jnp.pad(x1, ((0, m1p - m1), (0, 0)))
    x2p = jnp.pad(x2, ((0, m2p - m2), (0, 0)))
    b2d = b.reshape(-1, 1)               # (out_features, 1) column for broadcast

    out_padded = pl.pallas_call(
        _model_kernel,
        out_shape=jax.ShapeDtypeStruct((m2p, m1p), jnp.float32),
        in_specs=[
            pl.BlockSpec(x1p.shape, lambda: (0, 0)),
            pl.BlockSpec(x2p.shape, lambda: (0, 0)),
            pl.BlockSpec(w.shape, lambda: (0, 0)),
            pl.BlockSpec(b2d.shape, lambda: (0, 0)),
        ],
        out_specs=pl.BlockSpec((m2p, m1p), lambda: (0, 0)),
    )(x1p, x2p, w, b2d)

    return out_padded[:m2, :m1]          # (3, 2)


if __name__ == "__main__":
    key = jax.random.PRNGKey(0)
    k1, k2, kw, kb = jax.random.split(key, 4)

    # Shapes implied by the module: x1 (2,5), x2 (3,5) => fc1 = Linear(5, 5)
    in_features, out_features = 5, 5
    x1 = jax.random.normal(k1, (2, in_features), dtype=jnp.float32)
    x2 = jax.random.normal(k2, (3, in_features), dtype=jnp.float32)

    # Deterministic parameter init (PyTorch-Linear-like uniform bounds)
    bound = 1.0 / (in_features ** 0.5)
    w = jax.random.uniform(kw, (out_features, in_features),
                           minval=-bound, maxval=bound, dtype=jnp.float32)
    b = jax.random.uniform(kb, (out_features,),
                           minval=-bound, maxval=bound, dtype=jnp.float32)

    out = model_forward(x1, x2, w, b)
    jax.block_until_ready(out)

    # Reference check in plain JAX
    v1_ref = x1 @ w.T + b
    ref = x2 @ v1_ref.T
    assert out.shape == (3, 2)
    assert jnp.allclose(out, ref, atol=1e-5), "mismatch vs reference"

    print("KERNEL_OK")
</pallas_src>

<mosaic_0001>
module attributes {stable_mosaic.version = 11 : i64} {
  func.func @_model_kernel(%arg0: memref<128x5xf32, #tpu.memory_space<vmem>>, %arg1: memref<8x5xf32, #tpu.memory_space<vmem>>, %arg2: memref<5x5xf32, #tpu.memory_space<vmem>>, %arg3: memref<5x1xf32, #tpu.memory_space<vmem>>, %arg4: memref<8x128xf32, #tpu.memory_space<vmem>>) attributes {dimension_semantics = [], scalar_prefetch = 0 : i64, scratch_operands = 0 : i64, tpu.core_type = #tpu.core_type<tc>} {
    %c0 = arith.constant 0 : index
    %c0_0 = arith.constant 0 : index
    %0 = vector.load %arg2[%c0, %c0_0] : memref<5x5xf32, #tpu.memory_space<vmem>>, vector<5x5xf32>
    %c0_1 = arith.constant 0 : index
    %c0_2 = arith.constant 0 : index
    %1 = vector.load %arg0[%c0_1, %c0_2] : memref<128x5xf32, #tpu.memory_space<vmem>>, vector<128x5xf32>
    %cst = arith.constant dense<0.000000e+00> : vector<5x128xf32>
    %2 = tpu.matmul %0, %1, %cst {dimension_numbers = #tpu.dot_dimension_numbers<[1], [1], [0], [0], [0, 0, 1, 0], [], []>} : vector<5x5xf32>, vector<128x5xf32>, vector<5x128xf32> -> vector<5x128xf32>
    %c0_3 = arith.constant 0 : index
    %c0_4 = arith.constant 0 : index
    %3 = vector.load %arg3[%c0_3, %c0_4] : memref<5x1xf32, #tpu.memory_space<vmem>>, vector<5x1xf32>
    %4 = vector.broadcast %3 : vector<5x1xf32> to vector<5x128xf32>
    %5 = arith.addf %2, %4 : vector<5x128xf32>
    %c0_5 = arith.constant 0 : index
    %c0_6 = arith.constant 0 : index
    %6 = vector.load %arg1[%c0_5, %c0_6] : memref<8x5xf32, #tpu.memory_space<vmem>>, vector<8x5xf32>
    %cst_7 = arith.constant dense<0.000000e+00> : vector<8x128xf32>
    %7 = tpu.matmul %6, %5, %cst_7 {dimension_numbers = #tpu.dot_dimension_numbers<[1], [0], [0], [1], [0, 0, 1, 1], [], []>} : vector<8x5xf32>, vector<5x128xf32>, vector<8x128xf32> -> vector<8x128xf32>
    %c0_8 = arith.constant 0 : index
    %c0_9 = arith.constant 0 : index
    %8 = vector.load %arg4[%c0_8, %c0_9] : memref<8x128xf32, #tpu.memory_space<vmem>>, vector<8x128xf32>
    tpu.vector_store %arg4[%c0_8, %c0_9], %7 {strides = array<i32>} : memref<8x128xf32, #tpu.memory_space<vmem>>, vector<8x128xf32>,
    return
  }
}

</mosaic_0001>

<bundles_post_ra>
// kernel: model_forward.1
= control target key start
LH: loop header
LB: loop body
LE: loop exit
PB: predicated region body
PF: predicated region fallthrough
CT: control target
= control target key end

     0   :  { %vm40_vm0 = vcmask 39936   ;;  %v360_v0 = vmov 0.0|0.0   ;;  %vm361_vm2 = vmmov 0   ;;  %v362_v4 = vmov 0.0   ;;  %s473_s0 = inlined_call_operand.vmem [shape: f32[128,5], index: 0, kind: input, shape index: {}]   ;;  %s474_s3 = inlined_call_operand.vmem [shape: f32[5,1], index: 3, kind: input, shape index: {}]   ;;  %s475_s2 = inlined_call_operand.vmem [shape: f32[5,5], index: 2, kind: input, shape index: {}]   ;;  %s476_s1 = inlined_call_operand.vmem [shape: f32[8,5], index: 1, kind: input, shape index: {}]   ;;  %s477_s4 = inlined_call_operand.vmem [shape: f32[8,128], index: 4, kind: output, shape index: {}]  }
   0x1   :  { %323 = vmatprep.subr.bf16.mxu0 %v360_v0  ;;  %v18_v1 = vld [vmem:[%s473_s0] sm:$0xff]  ;;  %v19_v2 = vld [vmem:[%s473_s0 + $0x8] sm:$0xff]  ;;  %vm397_vm1 = vmpackc.low %vm40_vm0, %vm40_vm0  ;;  %315 = vmatprep.mubr.msk.f32.mxu0 %vm361_vm2, %v362_v4  ;;  %v363_v6 = vmov 0   ;;  %vm166_vm3 = vcmask 1044480  }
   0x2   :  { %v324_v5 = vpack.c.bf16 %v19_v2, %v18_v1  ;;  %359 = vset.pattern.permute.xlu0 %v363_v6  ;;  %318 = vmatprep.subr.mxu1 %v362_v4  ;;  %v20_v7 = vld [vmem:[%s473_s0 + $0x10] sm:$0xff]  ;;  %v21_v8 = vld [vmem:[%s473_s0 + $0x18] sm:$0xff]  ;;  %v34_v9 = vld [vmem:[%s474_s3] sm:$0x1f] }
   0x3   :  { %320 = vmatprep.mubr.msk.f32.mxu1 %vm361_vm2, %v362_v4  ;;  %v328_v10 = vpack.c.bf16 %v21_v8, %v20_v7  ;;  %37 = vperm.xlu0 %359, %v34_v9   ;;  %v22_v11 = vld [vmem:[%s473_s0 + $0x20] sm:$0xff]  ;;  %v23_v12 = vld [vmem:[%s473_s0 + $0x28] sm:$0xff]  ;;  %v24_v14 = vld [vmem:[%s473_s0 + $0x30] sm:$0xff] }
   0x4   :  { %326 = vmatpush3.bf16.xpose.msk.msra.mxu0 %vm397_vm1, %v324_v5  ;;  %v332_v13 = vpack.c.bf16 %v23_v12, %v22_v11  ;;  %v25_v15 = vld [vmem:[%s473_s0 + $0x38] sm:$0xff]  ;;  %v26_v17 = vld [vmem:[%s473_s0 + $0x40] sm:$0xff]  ;;  %v27_v18 = vld [vmem:[%s473_s0 + $0x48] sm:$0xff] }
   0x5   :  { %327 = vmatprep.subr.bf16.mxu0 %v360_v0  ;;  %v336_v16 = vpack.c.bf16 %v25_v15, %v24_v14  ;;  %v340_v19 = vpack.c.bf16 %v27_v18, %v26_v17  ;;  %v28_v20 = vld [vmem:[%s473_s0 + $0x50] sm:$0xff]  ;;  %v29_v21 = vld [vmem:[%s473_s0 + $0x58] sm:$0xff]  ;;  %v30_v23 = vld [vmem:[%s473_s0 + $0x60] sm:$0xff] }
   0x6   :  { %v344_v22 = vpack.c.bf16 %v29_v21, %v28_v20  ;;  %v31_v24 = vld [vmem:[%s473_s0 + $0x68] sm:$0xff]  ;;  %v32_v26 = vld [vmem:[%s473_s0 + $0x70] sm:$0xff]  ;;  %v33_v27 = vld [vmem:[%s473_s0 + $0x78] sm:$0xff] }
   0x7   :  { %v348_v25 = vpack.c.bf16 %v31_v24, %v30_v23  ;;  %v352_v28 = vpack.c.bf16 %v33_v27, %v32_v26  ;;  %v17_v29 = vld [vmem:[%s475_s2] sm:$0x1f] }
   0x8   :  { %v162_v34 = vld [vmem:[%s476_s1] sm:$0xff] }
   0xc   :  { %330 = vmatpush3.bf16.xpose.msk.msra.mxu0 %vm397_vm1, %v328_v10 }
   0xd   :  { %331 = vmatprep.subr.bf16.mxu0 %v360_v0 }
  0x14   :  { %334 = vmatpush3.bf16.xpose.msk.msra.mxu0 %vm397_vm1, %v332_v13 }
  0x15   :  { %335 = vmatprep.subr.bf16.mxu0 %v360_v0 }
  0x1c   :  { %338 = vmatpush3.bf16.xpose.msk.msra.mxu0 %vm397_vm1, %v336_v16 }
  0x1d   :  { %339 = vmatprep.subr.bf16.mxu0 %v360_v0 }
  0x24   :  { %342 = vmatpush3.bf16.xpose.msk.msra.mxu0 %vm397_vm1, %v340_v19 }
  0x25   :  { %343 = vmatprep.subr.bf16.mxu0 %v360_v0 }
  0x2c   :  { %346 = vmatpush3.bf16.xpose.msk.msra.mxu0 %vm397_vm1, %v344_v22 }
  0x2d   :  { %347 = vmatprep.subr.bf16.mxu0 %v360_v0 }
  0x34   :  { %350 = vmatpush3.bf16.xpose.msk.msra.mxu0 %vm397_vm1, %v348_v25 }
  0x35   :  { %351 = vmatprep.subr.bf16.mxu0 %v360_v0 }
  0x3c   :  { %354 = vmatpush3.bf16.xpose.msk.msra.mxu0 %vm397_vm1, %v352_v28 }
  0x43   :  { %316 = vmatmul.mubr.msk.f32.vlgmr.msra.gmra.mrb[0].mxu0 %vm40_vm0, %v17_v29 }
  0x82   :  { %v38_v30 = vpop.permute.xlu0 %37 }
 0x116   :  { %v158_v31 = vpop.f32.mrb[0].mxu0 }
 0x117   :  { %v159_v32 = vadd.f32 %v158_v31, %v38_v30  ;;  %v317_v33 = vpop.f32.mrb[1].mxu0 }
 0x119   :  { %319 = vmatpush3.msk.msra.mxu1 %vm166_vm3, %v159_v32 }
 0x11a   :  { %321 = vmatmul.mubr.msk.f32.vlgmr.msra.gmra.mrb[0].mxu1 %vm40_vm0, %v162_v34 }
 0x1ed   :  { %v236_v35 = vpop.f32.mrb[0].mxu1 }
 0x1ee   :  { %240 = vst [vmem:[%s477_s4] sm:$0xff] %v236_v35  ;;  %v322_v36 = vpop.f32.mrb[1].mxu1 }

</bundles_post_ra>
